<compile_context>
chip_gen: v5e
topology: v5e:2x2
jax: 0.10.0
libtpu: 0.0.40
codegen_flags: <defaults>
</compile_context>

<pallas_src>
import jax
import jax.numpy as jnp
from jax import lax
from jax.experimental import pallas as pl
from jax.experimental.pallas import tpu as pltpu

_MIB = 1024 * 1024


def _linear_kernel(x_ref, w_ref, b_ref, o_ref):
    """One (tm, tn) tile of y = x @ W.T + b, W kept in native (N, K) layout.

    x_ref: (tm, K), w_ref: (tn, K), b_ref: (1, tn), o_ref: (tm, tn).
    dot_general contracts the last dims of both operands directly (no
    transpose); f32 MXU accumulation, f32 bias add, single cast on the way out.
    """
    prec = (
        lax.Precision.HIGHEST
        if x_ref.dtype == jnp.float32
        else lax.Precision.DEFAULT
    )
    acc = lax.dot_general(
        x_ref[...],
        w_ref[...],
        dimension_numbers=(((1,), (1,)), ((), ())),
        preferred_element_type=jnp.float32,
        precision=prec,
    )
    o_ref[...] = (acc + b_ref[...].astype(jnp.float32)).astype(o_ref.dtype)


def _vmem_capacity_bytes():
    try:
        return int(pltpu.get_tpu_info().vmem_capacity_bytes)
    except Exception:
        return 64 * _MIB  # conservative fallback (v7x-sized)


def _working_set_bytes(tm, tn, K, itemsize, w_bufs=3):
    # 2 x-buffers + up to 3 weight buffers + 2 output buffers + 2 bias buffers.
    return (2 * tm * K + w_bufs * tn * K + 2 * tm * tn) * itemsize + 2 * tn * 4


def _select_tiles(B, N_pad, K, itemsize, budget):
    """Pick (tm, tn): MXU-friendly, lane-dense, VMEM-safe, megacore-friendly."""
    tm = B if B <= 256 else 256
    # Shrink the row tile if even tn=128 would blow the budget (huge feat_dim).
    while tm > 8 and _working_set_bytes(tm, 128, K, itemsize) > budget:
        tm = max(8, ((tm // 2) + 7) // 8 * 8)
    # TODO(synk): for feat_dim so large that even (tm=8, tn=128) full-K tiles
    # exceed VMEM, a K-tiled accumulator variant would be needed; classifier
    # heads do not hit that regime.
    cands = list(range(128, min(N_pad, 2048) + 1, 128))
    feas = [t for t in cands if _working_set_bytes(tm, t, K, itemsize) <= budget]
    if not feas:
        return tm, 128

    def score(t):
        g = pl.cdiv(N_pad, t)  # number of N blocks
        return (
            N_pad % t == 0,          # no partial output blocks
            g >= 2 and g % 2 == 0,   # even block count -> balanced v7x megacore
            t % 256 == 0,            # full 256x256 MXU passes on v6e/v7x
            t,                       # otherwise: bigger contiguous weight DMA
        )

    return tm, max(feas, key=score)


def _weight_spec(tn, K, grid_n):
    idx = lambda i, j: (j, 0)
    if grid_n >= 3:
        # Deeper weight pipeline: per-tile MXU work is tiny, so weight-DMA
        # latency is the exposed cost; a third buffer hides more of it.
        try:
            return pl.BlockSpec((tn, K), idx, pipeline_mode=pl.Buffered(3))
        except TypeError:  # older jax without pipeline_mode kwarg
            pass
    return pl.BlockSpec((tn, K), idx)


@jax.jit
def dot_product_classifier_forward(x, weight, bias):
    """Pallas implementation of DotProduct_Classifier.forward.

    x:      (B, feat_dim)
    weight: (num_classes, feat_dim)   -- native PyTorch nn.Linear layout
    bias:   (num_classes,)
    returns (logits, None) with logits shape (B, num_classes), dtype of x.
    """
    B, K = x.shape
    N, K2 = weight.shape
    assert K == K2, "feat_dim mismatch between x and weight"

    # Pad num_classes up to a multiple of 128: lane-dense (unmasked) output
    # stores and sublane-aligned (tn, K) weight blocks.
    N_pad = pl.cdiv(N, 128) * 128
    if N_pad != N:
        weight = jnp.pad(weight, ((0, N_pad - N), (0, 0)))
        bias = jnp.pad(bias, ((0, N_pad - N),))
    b2 = bias.reshape(1, N_pad)

    itemsize = jnp.dtype(x.dtype).itemsize

    # Generation-aware VMEM budget / scoped-VMEM cap.
    cap = _vmem_capacity_bytes()
    if cap <= 96 * _MIB:            # v7x-class parts: 64 MiB physical VMEM
        budget, limit_cap = 24 * _MIB, 48 * _MIB
    else:                           # v5e / v6e: 128 MiB physical VMEM
        budget, limit_cap = 48 * _MIB, 100 * _MIB

    tm, tn = _select_tiles(B, N_pad, K, itemsize, budget)
    grid_m = pl.cdiv(B, tm)
    grid_n = pl.cdiv(N_pad, tn)

    w_bufs = 3 if grid_n >= 3 else 2
    vmem_need = _working_set_bytes(tm, tn, K, itemsize, w_bufs=w_bufs)
    vmem_limit = int(min(limit_cap, max(32 * _MIB, (vmem_need * 3) // 2)))

    cost = pl.CostEstimate(
        flops=2 * B * N_pad * K,
        transcendentals=0,
        bytes_accessed=(B * K + N_pad * K + B * N_pad) * itemsize + N_pad * 4,
    )

    logits = pl.pallas_call(
        _linear_kernel,
        out_shape=jax.ShapeDtypeStruct((B, N_pad), x.dtype),
        grid_spec=pltpu.PrefetchScalarGridSpec(
            num_scalar_prefetch=0,
            grid=(grid_m, grid_n),
            in_specs=[
                pl.BlockSpec((tm, K), lambda i, j: (i, 0)),   # x rows, full K
                _weight_spec(tn, K, grid_n),                  # weight rows, full K
                pl.BlockSpec((1, tn), lambda i, j: (0, j)),   # bias slice
            ],
            out_specs=pl.BlockSpec((tm, tn), lambda i, j: (i, j)),
        ),
        compiler_params=pltpu.CompilerParams(
            dimension_semantics=("parallel", "parallel"),
            vmem_limit_bytes=vmem_limit,
        ),
        cost_estimate=cost,
    )(x, weight, b2)

    if N_pad != N:
        logits = logits[:, :N]

    # TODO(synk): training-mode MC-dropout mean/std lists are computed by the
    # reference module but never returned, so they are intentionally omitted.
    return logits, None


def init_params(key, num_classes, feat_dim):
    """Deterministic parameter init matching the module's __init__ semantics."""
    kw, kb = jax.random.split(key)
    # kaiming_normal (fan_in = feat_dim, gain = sqrt(2))
    std = (2.0 / feat_dim) ** 0.5
    weight = std * jax.random.normal(kw, (num_classes, feat_dim), jnp.float32)
    # nn.Linear default bias init: U(-1/sqrt(fan_in), 1/sqrt(fan_in))
    bound = 1.0 / (feat_dim ** 0.5)
    bias = jax.random.uniform(
        kb, (num_classes,), jnp.float32, minval=-bound, maxval=bound
    )
    return weight, bias


if __name__ == "__main__":
    key = jax.random.PRNGKey(0)
    kx, kp = jax.random.split(key)

    batch = 8
    feat_dim = 256
    num_classes = 200   # not a multiple of 128 -> exercises the padding path

    x = jax.random.normal(kx, (batch, feat_dim), jnp.float32)
    weight, bias = init_params(kp, num_classes, feat_dim)

    # f32 path (matches the PyTorch module's default dtype semantics).
    logits, aux = dot_product_classifier_forward(x, weight, bias)
    logits = jax.block_until_ready(logits)

    ref = jnp.matmul(x, weight.T, precision=lax.Precision.HIGHEST) + bias
    assert logits.shape == (batch, num_classes)
    assert aux is None
    assert jnp.allclose(logits, ref, atol=1e-4, rtol=1e-4)

    # bf16-input fast path (half the weight HBM bytes; f32 MXU accumulation).
    logits_bf16, _ = dot_product_classifier_forward(
        x.astype(jnp.bfloat16), weight.astype(jnp.bfloat16), bias
    )
    logits_bf16 = jax.block_until_ready(logits_bf16)
    assert jnp.allclose(logits_bf16.astype(jnp.float32), ref, atol=1e-1, rtol=1e-1)

    print("KERNEL_OK")
</pallas_src>

<mosaic_0001>
module attributes {stable_mosaic.version = 11 : i64} {
  func.func @_linear_kernel(%arg0: i32, %arg1: i32, %arg2: memref<8x256xf32, #tpu.memory_space<vmem>>, %arg3: memref<128x256xf32, #tpu.memory_space<vmem>>, %arg4: memref<1x128xf32, #tpu.memory_space<vmem>>, %arg5: memref<8x128xf32, #tpu.memory_space<vmem>>) attributes {dimension_semantics = [#tpu.dimension_semantics<parallel>, #tpu.dimension_semantics<parallel>], iteration_bounds = array<i64: 1, 2>, scalar_prefetch = 0 : i64, scratch_operands = 0 : i64, tpu.core_type = #tpu.core_type<tc>, window_params = [{transform_indices = @transform_0, window_bounds = array<i64: 8, 256>}, {transform_indices = @transform_1, window_bounds = array<i64: 128, 256>}, {transform_indices = @transform_2, window_bounds = array<i64: 1, 128>}, {transform_indices = @transform_3, window_bounds = array<i64: 8, 128>}]} {
    %c0 = arith.constant 0 : index
    %c0_0 = arith.constant 0 : index
    %0 = vector.load %arg2[%c0, %c0_0] : memref<8x256xf32, #tpu.memory_space<vmem>>, vector<8x256xf32>
    %c0_1 = arith.constant 0 : index
    %c0_2 = arith.constant 0 : index
    %1 = vector.load %arg3[%c0_1, %c0_2] : memref<128x256xf32, #tpu.memory_space<vmem>>, vector<128x256xf32>
    %cst = arith.constant dense<0.000000e+00> : vector<8x128xf32>
    %2 = tpu.matmul %0, %1, %cst {dimension_numbers = #tpu.dot_dimension_numbers<[1], [1], [0], [0], [0, 0, 1, 0], [], []>, precision = #tpu.contract_precision<fp32>} : vector<8x256xf32>, vector<128x256xf32>, vector<8x128xf32> -> vector<8x128xf32>
    %c0_3 = arith.constant 0 : index
    %c0_4 = arith.constant 0 : index
    %3 = vector.load %arg4[%c0_3, %c0_4] : memref<1x128xf32, #tpu.memory_space<vmem>>, vector<1x128xf32>
    %4 = vector.broadcast %3 : vector<1x128xf32> to vector<8x128xf32>
    %5 = arith.addf %2, %4 : vector<8x128xf32>
    %c0_5 = arith.constant 0 : index
    %c0_6 = arith.constant 0 : index
    %6 = vector.load %arg5[%c0_5, %c0_6] : memref<8x128xf32, #tpu.memory_space<vmem>>, vector<8x128xf32>
    tpu.vector_store %arg5[%c0_5, %c0_6], %5 {strides = array<i32>} : memref<8x128xf32, #tpu.memory_space<vmem>>, vector<8x128xf32>,
    return
  }
  func.func @transform_0(%arg0: i32, %arg1: i32) -> (i32, i32) {
    %c0_i32 = arith.constant 0 : i32
    %c0_i32_0 = arith.constant 0 : i32
    return %arg0, %c0_i32 : i32, i32
  }
  func.func @transform_1(%arg0: i32, %arg1: i32) -> (i32, i32) {
    %c0_i32 = arith.constant 0 : i32
    %c0_i32_0 = arith.constant 0 : i32
    return %arg1, %c0_i32 : i32, i32
  }
  func.func @transform_2(%arg0: i32, %arg1: i32) -> (i32, i32) {
    %c0_i32 = arith.constant 0 : i32
    %c0_i32_0 = arith.constant 0 : i32
    return %c0_i32, %arg1 : i32, i32
  }
  func.func @transform_3(%arg0: i32, %arg1: i32) -> (i32, i32) {
    %c0_i32 = arith.constant 0 : i32
    return %arg0, %arg1 : i32, i32
  }
}

</mosaic_0001>

<bundles_post_ra>
// kernel: dot_product_classifier_forward.1
= control target key start
LH: loop header
LB: loop body
LE: loop exit
PB: predicated region body
PF: predicated region fallthrough
CT: control target
= control target key end

     0   :  { %8 = vsyncpa [#allocation3], 0  ;;  %s1875_s0 = inlined_call_operand.vmem [shape: f32[8,256], index: 0, kind: input, shape index: {}]   ;;  %s1876_s1 = inlined_call_operand.vmem [shape: f32[256,256], index: 1, kind: input, shape index: {}]   ;;  %s1877_s2 = inlined_call_operand.vmem [shape: f32[1,256], index: 2, kind: input, shape index: {}]   ;;  %s1878_s3 = inlined_call_operand.hbm [shape: f32[8,256], index: 3, kind: output, shape index: {}]  }
   0x1   :  { %10 = vsyncpa [#allocation3 + $0x1], 0  ;;  %s1225_s12 = smov 0   ;;  %s1227_s13 = smov 0  }
   0x2   :  { %s1229_s14 = smov 0   ;;  %s1231_s15 = smov 0  }
   0x3   :  { %s1233_s16 = smov 0   ;;  %s1235_s17 = smov 0  }
   0x4 LB: > { %s1054_s18 = sadd.s32 4294967295, %s1203_s17   ;;  %s1055_s19 = sadd.s32 4294967294, %s1203_s17   ;;  %s1203_s17 = sphi %s1235_s17, %s16_s17   ;;  %s1199_s16 = sphi %s1233_s16, %s1909_s16   ;;  %s1195_s15 = sphi %s1231_s15, %s1908_s15   ;;  %s1191_s14 = sphi %s1229_s14, %s1907_s14   ;;  %s1187_s13 = sphi %s1227_s13, %s1906_s13   ;;  %s1183_s12 = sphi %s1225_s12, %s1905_s12  }
   0x5   : > { %s25_s20 = sadd.s32 1, %s1199_s16  ;;  %s115_s21 = sadd.s32 1, %s1191_s14 }
   0x6   : > { %p26_p0 = scmp.ge.s32.totalorder %s25_s20, 2  ;;  %p125_p1 = scmp.ne.s32.totalorder %s1191_s14, %s1187_s13 }
   0x7   : > { %p126_p2 = scmp.eq.s32.totalorder %s1054_s18, 1  ;;  %p131_p3 = scmp.ne.s32.totalorder %s1187_s13, %s1183_s12 }
   0x8   : > { %s1911_s20 = smov (%p26_p0, %s25_s20), 0  ;;  %p132_p5 = scmp.eq.s32.totalorder %s1055_s19, 1 }
   0x9   : > { %p1265_p4 = por %p126_p2, %p125_p1  ;;  %s111_s23 = ssub.s32 %s1199_s16, %s1911_s20 }
   0xa   : > { %p1059_p6 = scmp.ge.s32.totalorder %s1203_s17, 1  ;;  %p113_p7 = scmp.eq.s32.totalorder %s111_s23, 0 }
   0xb   : > { %p1272_p8 = por %p132_p5, %p131_p3  ;;  %p174_p9 = scmp.lt.s32.totalorder %s1203_s17, 3 }
   0xc   : > { %s1278_s25 = scalar_select %p113_p7, %s1191_s14, %s115_s21  }
   0xd   : > { %p175_p10 = pnand %p1059_p6, %p174_p9 }
   0xe   : > { %s1061_s26 = sshll.u32 (!%p175_p10), %s1195_s15, 4  ;;  %p219_p12 = scmp.lt.s32.totalorder (!%p175_p10), %s1195_s15, 1 }
   0xf   : > { %178 = sbr.rel (%p175_p10) target bundleno = 360 (0x168), region = 32  ;;  %p213_p11 = scmp.lt.s32.totalorder (!%p175_p10), %s1061_s26, 31 }
  0x10   : > { %s204_s21 = sand.u32 (!%p175_p10), 1, %s1187_s13   ;;  %s1145_s10 = scalar_lea.hbm (!%p175_p10), %s1878_s3, 16 }
  0x11   : > { %s1060_s23 = sshll.u32 (!%p175_p10), %s204_s21, 3 }
  0x14   : > { %s1913_s26 = smov (!%p213_p11, %s1061_s26), 31 }
  0x15   : > { %s1068_s27 = sshll.u32 %s1913_s26, 4  ;;  %s1065_s26 = sshll.u32 %s1195_s15, 3 }
  0x16   : > { %s1284_s30 = scalar_lea.vmem %s1876_s1, %s1068_s27  ;;  %s956_s29 = scalar_lea.hbm %s1878_s3, %s1065_s26 }
  0x17   : > { %v254_v0 = vld [vmem:[%s1284_s30 + $0xf0] sm:$0xff]  ;;  %v252_v1 = vld [vmem:[%s1284_s30 + $0xe0] sm:$0xff]  ;;  %s1559_s4 = scalar_select %p219_p12, %s1195_s15, 1 }
  0x18   : > { %v250_v2 = vld [vmem:[%s1284_s30 + $0xd0] sm:$0xff]  ;;  %v1289_v3 = vand.u32 4294901760, %v254_v0  ;;  %v1291_v4 = vand.u32 4294901760, %v252_v1  ;;  %v248_v6 = vld [vmem:[%s1284_s30 + $0xc0] sm:$0xff]  ;;  %s960_s5 = sshll.u32 %s956_s29, 4  ;;  %s944_s15 = scalar_lea.sflag [#allocation3], %s204_s21  ;;  %s961_s5 = int_to_ptr.hbm [resolvable:$true] %s960_s5 }
  0x19   : > { %v1293_v5 = vand.u32 4294901760, %v250_v2  ;;  %v1304_v9 = vand.u32 4294901760, %v248_v6  ;;  %v246_v11 = vld [vmem:[%s1284_s30 + $0xb0] sm:$0xff]  ;;  %v244_v19 = vld [vmem:[%s1284_s30 + $0xa0] sm:$0xff]  ;;  %s221_s7 = scalar_lea.vmem %s1877_s2, %s1559_s4  ;;  %s1139_s6 = sshra.s32 %s961_s5, 4  ;;  %s1140_s6 = int_to_ptr.hbm [resolvable:$true] %s1139_s6 }
  0x1a   : > { %261 = vmatpush.xpose.msra.mxu0 %v1289_v3  ;;  %v1298_v7 = vsub.f32 %v254_v0, %v1289_v3  ;;  %457 = vmatpush.xpose.msra.mxu3 %v1289_v3  ;;  %v1302_v8 = vsub.f32 %v252_v1, %v1291_v4  ;;  %v1313_v14 = vand.u32 4294901760, %v246_v11  ;;  %v1329_v21 = vand.u32 4294901760, %v244_v19  ;;  %v242_v26 = vld [vmem:[%s1284_s30 + $0x90] sm:$0xff]  ;;  %v240_v32 = vld [vmem:[%s1284_s30 + $0x80] sm:$0xff]  ;;  %p1146_p2 = scmp.lt.s32.totalorder %s1140_s6, %s1878_s3 }
  0x1b   : > { %v1307_v10 = vsub.f32 %v250_v2, %v1293_v5  ;;  %v1325_v18 = vsub.f32 %v248_v6, %v1304_v9  ;;  %v1342_v27 = vand.u32 4294901760, %v242_v26  ;;  %v1362_v36 = vand.u32 4294901760, %v240_v32  ;;  %v238_v38 = vld [vmem:[%s1284_s30 + $0x70] sm:$0xff]  ;;  %v236_v44 = vld [vmem:[%s1284_s30 + $0x60] sm:$0xff] }
  0x1c   : > { %404 = vmatpush.xpose.msra.mxu2 %v1298_v7  ;;  %v303_v12 = vand.u32 4294901760, %v1298_v7  ;;  %v309_v13 = vand.u32 4294901760, %v1302_v8  ;;  %v1337_v25 = vsub.f32 %v246_v11, %v1313_v14  ;;  %v1350_v31 = vsub.f32 %v244_v19, %v1329_v21  ;;  %v234_v50 = vld [vmem:[%s1284_s30 + $0x50] sm:$0xff]  ;;  %v232_v56 = vld [vmem:[%s1284_s30 + $0x40] sm:$0xff] }
  0x1d   : > { %v315_v17 = vand.u32 4294901760, %v1307_v10  ;;  %v321_v24 = vand.u32 4294901760, %v1325_v18  ;;  %v1356_v33 = vsub.f32 %v242_v26, %v1342_v27  ;;  %v1373_v42 = vand.u32 4294901760, %v238_v38  ;;  %v230_v62 = vld [vmem:[%s1284_s30 + $0x30] sm:$0xff]  ;;  %v228_v11 = vld [vmem:[%s1284_s30 + $0x20] sm:$0xff] }
  0x1e   : > { %263 = vmatpush.xpose.msra.mxu0 %v1291_v4  ;;  %v304_v15 = vsub.f32 %v1298_v7, %v303_v12  ;;  %459 = vmatpush.xpose.msra.mxu3 %v1291_v4  ;;  %v310_v16 = vsub.f32 %v1302_v8, %v309_v13  ;;  %v327_v30 = vand.u32 4294901760, %v1337_v25  ;;  %v333_v37 = vand.u32 4294901760, %v1350_v31  ;;  %v226_v26 = vld [vmem:[%s1284_s30 + $0x10] sm:$0xff] }
  0x1f   : > { %v316_v23 = vsub.f32 %v1307_v10, %v315_v17  ;;  %v322_v29 = vsub.f32 %v1325_v18, %v321_v24  ;;  %v339_v39 = vand.u32 4294901760, %v1356_v33  ;;  %v1376_v43 = vsub.f32 %v240_v32, %v1362_v36  ;;  %v253_v32 = vld [vmem:[%s1284_s30 + $0xe8] sm:$0xff] }
  0x20   : > { %v305_v20 = vand.u32 4294901760, %v304_v15  ;;  %407 = vmatpush.xpose.msra.mxu2 %v1302_v8  ;;  %v311_v22 = vand.u32 4294901760, %v310_v16  ;;  %v328_v35 = vsub.f32 %v1337_v25, %v327_v30  ;;  %v334_v41 = vsub.f32 %v1350_v31, %v333_v37  ;;  %v255_v16 = vld [vmem:[%s1284_s30 + $0xf8] sm:$0xff] }
  0x21   : > { %v317_v28 = vand.u32 4294901760, %v316_v23  ;;  %v323_v34 = vand.u32 4294901760, %v322_v29  ;;  %v340_v45 = vsub.f32 %v1356_v33, %v339_v39  ;;  %v1385_v47 = vand.u32 4294901760, %v236_v44 }
  0x22   : > { %265 = vmatpush.xpose.msra.mxu0 %v1293_v5  ;;  %306 = vmatpush.xpose.msra.mxu1 %v305_v20  ;;  %v329_v40 = vand.u32 4294901760, %v328_v35  ;;  %v335_v46 = vand.u32 4294901760, %v334_v41  ;;  %v345_v48 = vand.u32 4294901760, %v1376_v43  ;;  %v1389_v49 = vsub.f32 %v238_v38, %v1373_v42  ;;  %v224_v41 = vld [vmem:[%s1284_s30] sm:$0xff] }
  0x23   : > { %461 = vmatpush.xpose.msra.mxu3 %v1293_v5  ;;  %v341_v51 = vand.u32 4294901760, %v340_v45  ;;  %v1398_v53 = vand.u32 4294901760, %v234_v50  ;;  %v1402_v55 = vsub.f32 %v236_v44, %v1385_v47  ;;  %v1407_v57 = vand.u32 4294901760, %v232_v56 }
  0x24   : > { %410 = vmatpush.xpose.msra.mxu2 %v1307_v10  ;;  %v346_v52 = vsub.f32 %v1376_v43, %v345_v48  ;;  %v351_v54 = vand.u32 4294901760, %v1389_v49  ;;  %v1427_v2 = vand.u32 4294901760, %v230_v62  ;;  %v1454_v35 = vand.u32 4294901760, %v226_v26 }
  0x25   : > { %v357_v60 = vand.u32 4294901760, %v1402_v55  ;;  %v1415_v61 = vsub.f32 %v234_v50, %v1398_v53  ;;  %v1421_v63 = vsub.f32 %v232_v56, %v1407_v57  ;;  %v1466_v45 = vand.u32 4294901760, %v253_v32 }
  0x26   : > { %267 = vmatpush.xpose.msra.mxu0 %v1304_v9  ;;  %312 = vmatpush.xpose.msra.mxu1 %v311_v22  ;;  %v347_v58 = vand.u32 4294901760, %v346_v52  ;;  %v352_v59 = vsub.f32 %v1389_v49, %v351_v54  ;;  %v1439_v22 = vand.u32 4294901760, %v228_v11  ;;  %v1442_v23 = vsub.f32 %v230_v62, %v1427_v2 }
  0x27   : > { %463 = vmatpush.xpose.msra.mxu3 %v1304_v9  ;;  %v358_v1 = vsub.f32 %v1402_v55, %v357_v60  ;;  %v1884_v6 = vand.u32 4294901760, %v1415_v61  ;;  %v1883_v15 = vand.u32 4294901760, %v1421_v63  ;;  %v1473_v52 = vand.u32 4294901760, %v224_v41 }
  0x28   : > { %413 = vmatpush.xpose.msra.mxu2 %v1325_v18  ;;  %v353_v0 = vand.u32 4294901760, %v352_v59  ;;  %v1881_v38 = vand.u32 4294901760, %v1442_v23  ;;  %v237_v18 = vld [vmem:[%s1284_s30 + $0x68] sm:$0xff] }
  0x29   : > { %v359_v19 = vand.u32 4294901760, %v358_v1  ;;  %v364_v20 = vsub.f32 %v1415_v61, %v1884_v6  ;;  %v370_v29 = vsub.f32 %v1421_v63, %v1883_v15  ;;  %v249_v1 = vld [vmem:[%s1284_s30 + $0xc8] sm:$0xff] }
  0x2a   : > { %269 = vmatpush.xpose.msra.mxu0 %v1313_v14  ;;  %318 = vmatpush.xpose.msra.mxu1 %v317_v28  ;;  %v1447_v28 = vand.u32 4294901760, %v255_v16 }
  0x2b   : > { %465 = vmatpush.xpose.msra.mxu3 %v1313_v14  ;;  %v371_v50 = vand.u32 4294901760, %v370_v29 }
  0x2c   : > { %416 = vmatpush.xpose.msra.mxu2 %v1337_v25  ;;  %v1464_v44 = vsub.f32 %v255_v16, %v1447_v28  ;;  %v235_v25 = vld [vmem:[%s1284_s30 + $0x58] sm:$0xff] }
  0x2e   : > { %271 = vmatpush.xpose.msra.mxu0 %v1329_v21  ;;  %324 = vmatpush.xpose.msra.mxu1 %v323_v34  ;;  %v365_v34 = vand.u32 4294901760, %v364_v20  ;;  %v1879_v62 = vand.u32 4294901760, %v1464_v44  ;;  %v1494_v20 = vsub.f32 %v224_v41, %v1473_v52 }
  0x2f   : > { %467 = vmatpush.xpose.msra.mxu3 %v1329_v21 }
  0x30   : > { %419 = vmatpush.xpose.msra.mxu2 %v1350_v31  ;;  %v645_v29 = vsub.f32 %v1464_v44, %v1879_v62 }
  0x32   : > { %273 = vmatpush.xpose.msra.mxu0 %v1342_v27  ;;  %330 = vmatpush.xpose.msra.mxu1 %v329_v40  ;;  %v1458_v40 = vsub.f32 %v228_v11, %v1439_v22 }
  0x33   : > { %469 = vmatpush.xpose.msra.mxu3 %v1342_v27 }
  0x34   : > { %422 = vmatpush.xpose.msra.mxu2 %v1356_v33  ;;  %v1880_v56 = vand.u32 4294901760, %v1458_v40 }
  0x36   : > { %275 = vmatpush.xpose.msra.mxu0 %v1362_v36  ;;  %336 = vmatpush.xpose.msra.mxu1 %v335_v46  ;;  %v251_v46 = vld [vmem:[%s1284_s30 + $0xd8] sm:$0xff]  ;;  %v382_v16 = vsub.f32 %v1458_v40, %v1880_v56  ;;  %v646_v56 = vand.u32 4294901760, %v645_v29 }
  0x37   : > { %471 = vmatpush.xpose.msra.mxu3 %v1362_v36  ;;  %v1480_v59 = vand.u32 4294901760, %v251_v46 }
  0x38   : > { %425 = vmatpush.xpose.msra.mxu2 %v1376_v43  ;;  %v383_v41 = vand.u32 4294901760, %v382_v16  ;;  %v229_v43 = vld [vmem:[%s1284_s30 + $0x28] sm:$0xff] }
  0x3a   : > { %277 = vmatpush.xpose.msra.mxu0 %v1373_v42  ;;  %342 = vmatpush.xpose.msra.mxu1 %v341_v51  ;;  %v376_v51 = vsub.f32 %v1442_v23, %v1881_v38 }
  0x3b   : > { %473 = vmatpush.xpose.msra.mxu3 %v1373_v42 }
  0x3c   : > { %428 = vmatpush.xpose.msra.mxu2 %v1389_v49  ;;  %v377_v11 = vand.u32 4294901760, %v376_v51  ;;  %v1887_v51 = vand.u32 4294901760, %v1494_v20  ;;  %v227_v49 = vld [vmem:[%s1284_s30 + $0x18] sm:$0xff] }
  0x3e   : > { %279 = vmatpush.xpose.msra.mxu0 %v1385_v47  ;;  %348 = vmatpush.xpose.msra.mxu1 %v347_v58  ;;  %v1477_v58 = vsub.f32 %v226_v26, %v1454_v35  ;;  %v1498_v26 = vsub.f32 %v251_v46, %v1480_v59  ;;  %v394_v6 = vsub.f32 %v1494_v20, %v1887_v51 }
  0x3f   : > { %475 = vmatpush.xpose.msra.mxu3 %v1385_v47 }
  0x40   : > { %431 = vmatpush.xpose.msra.mxu2 %v1402_v55  ;;  %v1886_v62 = vand.u32 4294901760, %v1498_v26  ;;  %v1893_v55 = vand.u32 4294901760, %v1415_v61 }
  0x42   : > { %281 = vmatpush.xpose.msra.mxu0 %v1398_v53  ;;  %354 = vmatpush.xpose.msra.mxu1 %v353_v0  ;;  %v1485_v0 = vsub.f32 %v253_v32, %v1466_v45 }
  0x43   : > { %477 = vmatpush.xpose.msra.mxu3 %v1398_v53 }
  0x44   : > { %434 = vmatpush.xpose.msra.mxu2 %v1415_v61  ;;  %v1885_v32 = vand.u32 4294901760, %v1485_v0  ;;  %v223_v61 = vld [vmem:[%s1875_s0 + $0x8] sm:$0xff] }
  0x46   : > { %283 = vmatpush.xpose.msra.mxu0 %v1407_v57  ;;  %360 = vmatpush.xpose.msra.mxu1 %v359_v19  ;;  %v1882_v19 = vand.u32 4294901760, %v1477_v58  ;;  %v651_v38 = vsub.f32 %v1485_v0, %v1885_v32  ;;  %v395_v32 = vand.u32 4294901760, %v394_v6 }
  0x47   : > { %479 = vmatpush.xpose.msra.mxu3 %v1407_v57 }
  0x48   : > { %437 = vmatpush.xpose.msra.mxu2 %v1421_v63  ;;  %v388_v46 = vsub.f32 %v1477_v58, %v1882_v19  ;;  %v245_v19 = vld [vmem:[%s1284_s30 + $0xa8] sm:$0xff]  ;;  %v652_v29 = vand.u32 4294901760, %v651_v38 }
  0x49   : > { %v1540_v7 = vand.u32 4294901760, %v245_v19 }
  0x4a   : > { %285 = vmatpush.xpose.msra.mxu0 %v1427_v2  ;;  %366 = vmatpush.xpose.msra.mxu1 %v365_v34  ;;  %v1505_v34 = vand.u32 4294901760, %v249_v1  ;;  %v389_v15 = vand.u32 4294901760, %v388_v46 }
  0x4b   : > { %481 = vmatpush.xpose.msra.mxu3 %v1427_v2 }
  0x4c   : > { %440 = vmatpush.xpose.msra.mxu2 %v1442_v23 }
  0x4e   : > { %287 = vmatpush.xpose.msra.mxu0 %v1439_v22  ;;  %372 = vmatpush.xpose.msra.mxu1 %v371_v50  ;;  %v247_v50 = vld [vmem:[%s1284_s30 + $0xb8] sm:$0xff] }
  0x4f   : > { %483 = vmatpush.xpose.msra.mxu3 %v1439_v22  ;;  %v1522_v16 = vand.u32 4294901760, %v247_v50 }
  0x50   : > { %443 = vmatpush.xpose.msra.mxu2 %v1458_v40 }
  0x51   : > { %v1538_v46 = vsub.f32 %v247_v50, %v1522_v16  ;;  %v1552_v50 = vsub.f32 %v245_v19, %v1540_v7 }
  0x52   : > { %289 = vmatpush.xpose.msra.mxu0 %v1454_v35  ;;  %378 = vmatpush.xpose.msra.mxu1 %v377_v11  ;;  %v1520_v11 = vsub.f32 %v249_v1, %v1505_v34  ;;  %v657_v1 = vsub.f32 %v1498_v26, %v1886_v62 }
  0x53   : > { %485 = vmatpush.xpose.msra.mxu3 %v1454_v35  ;;  %v1890_v19 = vand.u32 4294901760, %v1552_v50 }
  0x54   : > { %446 = vmatpush.xpose.msra.mxu2 %v1477_v58  ;;  %v658_v62 = vand.u32 4294901760, %v657_v1 }
  0x55   : > { %v675_v1 = vsub.f32 %v1552_v50, %v1890_v19 }
  0x56   : > { %291 = vmatpush.xpose.msra.mxu0 %v1473_v52  ;;  %384 = vmatpush.xpose.msra.mxu1 %v383_v41  ;;  %v662_v41 = vand.u32 4294901760, %v1520_v11 }
  0x57   : > { %487 = vmatpush.xpose.msra.mxu3 %v1473_v52 }
  0x58   : > { %449 = vmatpush.xpose.msra.mxu2 %v1494_v20  ;;  %v663_v38 = vsub.f32 %v1520_v11, %v662_v41 }
  0x5a   : > { %498 = vmatpush.xpose.msrb.mxu0 %v303_v12  ;;  %v243_v12 = vld [vmem:[%s1284_s30 + $0x98] sm:$0xff]  ;;  %390 = vmatpush.xpose.msra.mxu1 %v389_v15  ;;  %v241_v15 = vld [vmem:[%s1284_s30 + $0x88] sm:$0xff] }
  0x5b   : > { %647 = vmatpush.xpose.msrb.mxu3 %v646_v56  ;;  %v668_v56 = vand.u32 4294901760, %v1538_v46  ;;  %v1554_v51 = vand.u32 4294901760, %v243_v12  ;;  %v1564_v8 = vand.u32 4294901760, %v241_v15 }
  0x5c   : > { %602 = vmatpush.xpose.msrb.mxu2 %v1447_v28 }
  0x5d   : > { %v669_v6 = vsub.f32 %v1538_v46, %v668_v56  ;;  %v1575_v10 = vsub.f32 %v243_v12, %v1554_v51  ;;  %v676_v12 = vand.u32 4294901760, %v675_v1  ;;  %v1622_v1 = vand.u32 4294901760, %v235_v25 }
  0x5e   : > { %502 = vmatpush.xpose.msrb.mxu0 %v309_v13  ;;  %396 = vmatpush.xpose.msra.mxu1 %v395_v32  ;;  %v664_v13 = vand.u32 4294901760, %v663_v38 }
  0x5f   : > { %653 = vmatpush.xpose.msrb.mxu3 %v652_v29  ;;  %v670_v32 = vand.u32 4294901760, %v669_v6  ;;  %v1888_v29 = vand.u32 4294901760, %v1575_v10 }
  0x60   : > { %604 = vmatpush.xpose.msrb.mxu2 %v1466_v45 }
  0x61   : > { %v681_v38 = vsub.f32 %v1575_v10, %v1888_v29 }
  0x62   : > { %506 = vmatpush.xpose.msrb.mxu0 %v315_v17  ;;  %565 = vmatpush.xpose.msrb.mxu1 %v1289_v3  ;;  %v239_v17 = vld [vmem:[%s1284_s30 + $0x78] sm:$0xff]  ;;  %v1583_v3 = vsub.f32 %v241_v15, %v1564_v8  ;;  %v1603_v15 = vand.u32 4294901760, %v237_v18 }
  0x63   : > { %659 = vmatpush.xpose.msrb.mxu3 %v658_v62  ;;  %v1585_v62 = vand.u32 4294901760, %v239_v17 }
  0x64   : > { %606 = vmatpush.xpose.msrb.mxu2 %v1480_v59 }
  0x66   : > { %510 = vmatpush.xpose.msrb.mxu0 %v321_v24  ;;  %567 = vmatpush.xpose.msrb.mxu1 %v1291_v4  ;;  %v1889_v4 = vand.u32 4294901760, %v1583_v3  ;;  %v1598_v24 = vsub.f32 %v239_v17, %v1585_v62  ;;  %v682_v17 = vand.u32 4294901760, %v681_v38  ;;  %v1636_v38 = vsub.f32 %v235_v25, %v1622_v1 }
  0x67   : > { %665 = vmatpush.xpose.msrb.mxu3 %v664_v13 }
  0x68   : > { %608 = vmatpush.xpose.msrb.mxu2 %v1505_v34  ;;  %v687_v13 = vsub.f32 %v1583_v3, %v1889_v4  ;;  %v692_v6 = vand.u32 4294901760, %v1598_v24  ;;  %v231_v4 = vld [vmem:[%s1284_s30 + $0x38] sm:$0xff] }
  0x69   : > { %v1645_v33 = vand.u32 4294901760, %v231_v4 }
  0x6a   : > { %514 = vmatpush.xpose.msrb.mxu0 %v327_v30  ;;  %569 = vmatpush.xpose.msrb.mxu1 %v1293_v5  ;;  %v222_v5 = vld [vmem:[%s1875_s0] sm:$0xff] }
  0x6b   : > { %671 = vmatpush.xpose.msrb.mxu3 %v670_v32  ;;  %v1610_v30 = vand.u32 4294901760, %v222_v5  ;;  %v1620_v32 = vsub.f32 %v237_v18, %v1603_v15  ;;  %v693_v18 = vsub.f32 %v1598_v24, %v692_v6 }
  0x6c   : > { %610 = vmatpush.xpose.msrb.mxu2 %v1522_v16 }
  0x6d   : > { %v293_v29 = vsub.f32 %v222_v5, %v1610_v30  ;;  %398 = vmatmul.f32.vlgmr.msra.gmra.mxu1 %v1610_v30 }
  0x6e   : > { %518 = vmatpush.xpose.msrb.mxu0 %v333_v37  ;;  %571 = vmatpush.xpose.msrb.mxu1 %v1304_v9  ;;  %v233_v9 = vld [vmem:[%s1284_s30 + $0x48] sm:$0xff]  ;;  %v688_v37 = vand.u32 4294901760, %v687_v13 }
  0x6f   : > { %677 = vmatpush.xpose.msrb.mxu3 %v676_v12  ;;  %v294_v31 = vand.u32 4294901760, %v293_v29  ;;  %452 = vmatmul.f32.vlgmr.msra.gmra.mxu2 %v293_v29  ;;  %v698_v12 = vand.u32 4294901760, %v1620_v32  ;;  %v1638_v5 = vand.u32 4294901760, %v233_v9 }
  0x70   : > { %612 = vmatpush.xpose.msrb.mxu2 %v1540_v7 }
  0x71   : > { %v295_v19 = vsub.f32 %v293_v29, %v294_v31  ;;  %491 = vmatmul.f32.vlgmr.msra.gmra.mxu3 %v294_v31  ;;  %v699_v25 = vsub.f32 %v1620_v32, %v698_v12  ;;  %v704_v29 = vand.u32 4294901760, %v1636_v38  ;;  %v1652_v13 = vsub.f32 %v233_v9, %v1638_v5 }
  0x72   : > { %522 = vmatpush.xpose.msrb.mxu0 %v339_v39  ;;  %573 = vmatpush.xpose.msrb.mxu1 %v1313_v14  ;;  %v694_v39 = vand.u32 4294901760, %v693_v18  ;;  %v1666_v9 = vand.u32 4294901760, %v229_v43  ;;  %v225_v18 = vld [vmem:[%s1284_s30 + $0x8] sm:$0xff]  ;;  %s206_s30 = scalar_lea.vmem [#allocation2], %s1060_s23 }
  0x73   : > { %683 = vmatpush.xpose.msrb.mxu3 %v682_v17  ;;  %v296_v14 = vand.u32 4294901760, %v295_v19  ;;  %v705_v19 = vsub.f32 %v1636_v38, %v704_v29  ;;  %v710_v17 = vand.u32 4294901760, %v1652_v13  ;;  %s958_s4 = sshll.u32 %s206_s30, 4  ;;  %s959_s4 = int_to_ptr.vmem [resolvable:$true] %s958_s4 }
  0x74   : > { %614 = vmatpush.xpose.msrb.mxu2 %v1554_v51  ;;  %v1678_v31 = vsub.f32 %v229_v43, %v1666_v9 }
  0x75   : > { %297 = vmatmul.f32.vlgmr.msra.gmra.mxu0 %v296_v14 }
  0x76   : > { %526 = vmatpush.xpose.msrb.mxu0 %v345_v48  ;;  %575 = vmatpush.xpose.msrb.mxu1 %v1329_v21  ;;  %v1660_v21 = vsub.f32 %v231_v4, %v1645_v33  ;;  %v700_v48 = vand.u32 4294901760, %v699_v25  ;;  %v711_v4 = vsub.f32 %v1652_v13, %v710_v17  ;;  %v722_v14 = vand.u32 4294901760, %v1678_v31 }
  0x77   : > { %689 = vmatpush.xpose.msrb.mxu3 %v688_v37  ;;  %v1680_v37 = vand.u32 4294901760, %v227_v49  ;;  %v1694_v25 = vand.u32 4294901760, %v225_v18 }
  0x78   : > { %616 = vmatpush.xpose.msrb.mxu2 %v1564_v8 }
  0x7a   : > { %530 = vmatpush.xpose.msrb.mxu0 %v351_v54  ;;  %577 = vmatpush.xpose.msrb.mxu1 %v1342_v27  ;;  %v716_v27 = vand.u32 4294901760, %v1660_v21  ;;  %v706_v54 = vand.u32 4294901760, %v705_v19 }
  0x7b   : > { %695 = vmatpush.xpose.msrb.mxu3 %v694_v39  ;;  %v1692_v39 = vsub.f32 %v227_v49, %v1680_v37  ;;  %v1708_v49 = vsub.f32 %v225_v18, %v1694_v25 }
  0x7c   : > { %618 = vmatpush.xpose.msrb.mxu2 %v1585_v62 }
  0x7d   : > { %v728_v19 = vand.u32 4294901760, %v1692_v39 }
  0x7e   : > { %534 = vmatpush.xpose.msrb.mxu0 %v357_v60  ;;  %579 = vmatpush.xpose.msrb.mxu1 %v1362_v36  ;;  %v717_v36 = vsub.f32 %v1660_v21, %v716_v27  ;;  %v712_v60 = vand.u32 4294901760, %v711_v4 }
  0x7f   : > { %701 = vmatpush.xpose.msrb.mxu3 %v700_v48  ;;  %v723_v48 = vsub.f32 %v1678_v31, %v722_v14  ;;  %v729_v4 = vsub.f32 %v1692_v39, %v728_v19 }
  0x80   : > { %620 = vmatpush.xpose.msrb.mxu2 %v1603_v15  ;;  %v718_v43 = vand.u32 4294901760, %v717_v36  ;;  %v1896_v36 = vand.u32 4294901760, %v1458_v40 }
  0x82   : > { %538 = vmatpush.xpose.msrb.mxu0 %v1893_v55  ;;  %581 = vmatpush.xpose.msrb.mxu1 %v1373_v42  ;;  %v1894_v42 = vand.u32 4294901760, %v1421_v63  ;;  %v1895_v63 = vand.u32 4294901760, %v1442_v23  ;;  %v734_v55 = vand.u32 4294901760, %v1708_v49 }
  0x83   : > { %707 = vmatpush.xpose.msrb.mxu3 %v706_v54  ;;  %v1710_v54 = vand.u32 4294901760, %v223_v61 }
  0x84   : > { %622 = vmatpush.xpose.msrb.mxu2 %v1622_v1  ;;  %v735_v23 = vsub.f32 %v1708_v49, %v734_v55 }
  0x85   : > { %v1721_v18 = vsub.f32 %v223_v61, %v1710_v54  ;;  %v1897_v61 = vand.u32 4294901760, %v1477_v58 }
  0x86   : > { %542 = vmatpush.xpose.msrb.mxu0 %v1894_v42  ;;  %583 = vmatpush.xpose.msrb.mxu1 %v1385_v47  ;;  %v724_v47 = vand.u32 4294901760, %v723_v48  ;;  %v736_v40 = vand.u32 4294901760, %v735_v23  ;;  %v1898_v42 = vand.u32 4294901760, %v1494_v20 }
  0x87   : > { %713 = vmatpush.xpose.msrb.mxu3 %v712_v60  ;;  %v635_v60 = vand.u32 4294901760, %v1721_v18 }
  0x88   : > { %624 = vmatpush.xpose.msrb.mxu2 %v1638_v5 }
  0x8a   : > { %546 = vmatpush.xpose.msrb.mxu0 %v1895_v63  ;;  %585 = vmatpush.xpose.msrb.mxu1 %v1398_v53  ;;  %v730_v53 = vand.u32 4294901760, %v729_v4 }
  0x8b   : > { %719 = vmatpush.xpose.msrb.mxu3 %v718_v43 }
  0x8c   : > { %626 = vmatpush.xpose.msrb.mxu2 %v1645_v33 }
  0x8e   : > { %550 = vmatpush.xpose.msrb.mxu0 %v1896_v36  ;;  %587 = vmatpush.xpose.msrb.mxu1 %v1407_v57  ;;  %v636_v57 = vsub.f32 %v1721_v18, %v635_v60 }
  0x8f   : > { %725 = vmatpush.xpose.msrb.mxu3 %v724_v47 }
  0x90   : > { %628 = vmatpush.xpose.msrb.mxu2 %v1666_v9  ;;  %v637_v58 = vand.u32 4294901760, %v636_v57 }
  0x92   : > { %554 = vmatpush.xpose.msrb.mxu0 %v1897_v61  ;;  %589 = vmatpush.xpose.msrb.mxu1 %v1427_v2  ;;  %v1899_v2 = vand.u32 4294901760, %v1464_v44 }
  0x93   : > { %731 = vmatpush.xpose.msrb.mxu3 %v730_v53 }
  0x94   : > { %630 = vmatpush.xpose.msrb.mxu2 %v1680_v37 }
  0x96   : > { %558 = vmatpush.xpose.msrb.mxu0 %v1898_v42  ;;  %591 = vmatpush.xpose.msrb.mxu1 %v1439_v22  ;;  %v1900_v22 = vand.u32 4294901760, %v1485_v0 }
  0x97   : > { %737 = vmatpush.xpose.msrb.mxu3 %v736_v40 }
  0x98   : > { %632 = vmatpush.xpose.msrb.mxu2 %v1694_v25 }
  0x99   : > { %560 = vmatmul.f32.vlgmr.msrb.gmra.mxu0 %v1610_v30 }
  0x9a   : > { %745 = vmatpush.xpose.msra.mxu0 %v1464_v44  ;;  %593 = vmatpush.xpose.msrb.mxu1 %v1454_v35  ;;  %v1901_v35 = vand.u32 4294901760, %v1498_v26  ;;  %v1903_v44 = vand.u32 4294901760, %v1575_v10 }
  0x9b   : > { %906 = vmatpush.xpose.msra.mxu3 %v1447_v28  ;;  %638 = vmatmul.f32.vlgmr.msrb.gmra.mxu2 %v637_v58 }
  0x9c   : > { %839 = vmatpush.xpose.msra.mxu2 %v1899_v2  ;;  %739 = vmatmul.f32.vlgmr.msrb.gmra.mxu3 %v1710_v54 }
  0x9e   : > { %748 = vmatpush.xpose.msra.mxu0 %v1485_v0  ;;  %595 = vmatpush.xpose.msrb.mxu1 %v1473_v52  ;;  %v1124_v52 = vld [vmem:[%s221_s7] ss:$0 sm:$0xff]  ;;  %s1141_s7 = scalar_lea.hbm %s1140_s6, 8 }
  0x9f   : > { %908 = vmatpush.xpose.msra.mxu3 %v1466_v45  ;;  %p1142_p13 = scmp.ne.s32.totalorder %s1140_s6, %s1141_s7  ;;  %p1147_p3 = scmp.lt.s32.totalorder %s1145_s10, %s1141_s7 }
  0xa0   : > { %843 = vmatpush.xpose.msra.mxu2 %v1900_v22 }
  0xa1   : > { %597 = vmatmul.f32.vlgmr.msrb.gmra.mxu1 %v1610_v30  ;;  %p1143_p0 = pnand %p1142_p13, %p1265_p4  ;;  %p1148_p5 = por %p1147_p3, %p1146_p2 }
  0xa2   : > { %751 = vmatpush.xpose.msra.mxu0 %v1498_v26  ;;  %798 = vmatpush.xpose.msra.mxu1 %v1447_v28  ;;  %v1902_v28 = vand.u32 4294901760, %v1552_v50 }
  0xa3   : > { %910 = vmatpush.xpose.msra.mxu3 %v1480_v59  ;;  %p1144_p1 = pneg %p1143_p0 }
  0xa4   : > { %847 = vmatpush.xpose.msra.mxu2 %v1901_v35 }
  0xa5   : > { %p1149_p6 = pnand %p1148_p5, %p1144_p1 }
  0xa6   : > { %754 = vmatpush.xpose.msra.mxu0 %v1520_v11  ;;  %800 = vmatpush.xpose.msra.mxu1 %v1466_v45  ;;  %v1904_v45 = vand.u32 4294901760, %v1583_v3 }
  0xa7   : > { %912 = vmatpush.xpose.msra.mxu3 %v1505_v34 }
  0xa8   : > { %851 = vmatpush.xpose.msra.mxu2 %v662_v41 }
  0xaa   : > { %757 = vmatpush.xpose.msra.mxu0 %v1538_v46  ;;  %802 = vmatpush.xpose.msra.mxu1 %v1480_v59 }
  0xab   : > { %914 = vmatpush.xpose.msra.mxu3 %v1522_v16 }
  0xac   : > { %855 = vmatpush.xpose.msra.mxu2 %v668_v56 }
  0xae   : > { %760 = vmatpush.xpose.msra.mxu0 %v1552_v50  ;;  %804 = vmatpush.xpose.msra.mxu1 %v1505_v34 }
  0xaf   : > { %916 = vmatpush.xpose.msra.mxu3 %v1540_v7 }
  0xb0   : > { %859 = vmatpush.xpose.msra.mxu2 %v1902_v28 }
  0xb2   : > { %763 = vmatpush.xpose.msra.mxu0 %v1575_v10  ;;  %806 = vmatpush.xpose.msra.mxu1 %v1522_v16 }
  0xb3   : > { %918 = vmatpush.xpose.msra.mxu3 %v1554_v51 }
  0xb4   : > { %863 = vmatpush.xpose.msra.mxu2 %v1903_v44 }
  0xb6   : > { %766 = vmatpush.xpose.msra.mxu0 %v1583_v3  ;;  %808 = vmatpush.xpose.msra.mxu1 %v1540_v7 }
  0xb7   : > { %920 = vmatpush.xpose.msra.mxu3 %v1564_v8 }
  0xb8   : > { %867 = vmatpush.xpose.msra.mxu2 %v1904_v45 }
  0xba   : > { %769 = vmatpush.xpose.msra.mxu0 %v1598_v24  ;;  %810 = vmatpush.xpose.msra.mxu1 %v1554_v51 }
  0xbb   : > { %922 = vmatpush.xpose.msra.mxu3 %v1585_v62 }
  0xbc   : > { %871 = vmatpush.xpose.msra.mxu2 %v692_v6 }
  0xbe   : > { %772 = vmatpush.xpose.msra.mxu0 %v1620_v32  ;;  %812 = vmatpush.xpose.msra.mxu1 %v1564_v8 }
  0xbf   : > { %924 = vmatpush.xpose.msra.mxu3 %v1603_v15 }
  0xc0   : > { %875 = vmatpush.xpose.msra.mxu2 %v698_v12 }
  0xc2   : > { %775 = vmatpush.xpose.msra.mxu0 %v1636_v38  ;;  %814 = vmatpush.xpose.msra.mxu1 %v1585_v62 }
  0xc3   : > { %926 = vmatpush.xpose.msra.mxu3 %v1622_v1 }
  0xc4   : > { %879 = vmatpush.xpose.msra.mxu2 %v704_v29 }
  0xc6   : > { %778 = vmatpush.xpose.msra.mxu0 %v1652_v13  ;;  %816 = vmatpush.xpose.msra.mxu1 %v1603_v15 }
  0xc7   : > { %928 = vmatpush.xpose.msra.mxu3 %v1638_v5 }
  0xc8   : > { %883 = vmatpush.xpose.msra.mxu2 %v710_v17 }
  0xca   : > { %781 = vmatpush.xpose.msra.mxu0 %v1660_v21  ;;  %818 = vmatpush.xpose.msra.mxu1 %v1622_v1 }
  0xcb   : > { %930 = vmatpush.xpose.msra.mxu3 %v1645_v33 }
  0xcc   : > { %887 = vmatpush.xpose.msra.mxu2 %v716_v27 }
  0xce   : > { %784 = vmatpush.xpose.msra.mxu0 %v1678_v31  ;;  %820 = vmatpush.xpose.msra.mxu1 %v1638_v5 }
  0xcf   : > { %932 = vmatpush.xpose.msra.mxu3 %v1666_v9 }
  0xd0   : > { %891 = vmatpush.xpose.msra.mxu2 %v722_v14 }
  0xd2   : > { %787 = vmatpush.xpose.msra.mxu0 %v1692_v39  ;;  %822 = vmatpush.xpose.msra.mxu1 %v1645_v33 }
  0xd3   : > { %934 = vmatpush.xpose.msra.mxu3 %v1680_v37 }
  0xd4   : > { %895 = vmatpush.xpose.msra.mxu2 %v728_v19 }
  0xd6   : > { %790 = vmatpush.xpose.msra.mxu0 %v1708_v49  ;;  %824 = vmatpush.xpose.msra.mxu1 %v1666_v9 }
  0xd7   : > { %936 = vmatpush.xpose.msra.mxu3 %v1694_v25 }
  0xd8   : > { %899 = vmatpush.xpose.msra.mxu2 %v734_v55 }
  0xd9   : > { %793 = vmatmul.f32.vlgmr.msra.gmra.mxu0 %v1721_v18 }
  0xda   : > { %826 = vmatpush.xpose.msra.mxu1 %v1680_v37  ;;  %938 = vmatmul.f32.vlgmr.msra.gmra.mxu3 %v1710_v54 }
  0xdb   : > { %901 = vmatmul.f32.vlgmr.msra.gmra.mxu2 %v1710_v54 }
  0xde   : > { %828 = vmatpush.xpose.msra.mxu1 %v1694_v25 }
  0xe1   : > { %832 = vmatmul.f32.vlgmr.msra.gmra.mxu1 %v635_v60 }
  0xea   : > { %v399_v20 = vpop.f32.mrf.mxu1 }
  0xf2   : > { %v298_v59 = vpop.f32.mrf.mxu0  ;;  %v453_v34 = vpop.f32.mrf.mxu2 }
  0xf3   : > { %v299_v0 = vadd.f32 %v1124_v52, %v298_v59 }
  0xf4   : > { %v492_v11 = vpop.f32.mrf.mxu3 }
  0xf5   : > { %v400_v26 = vadd.f32 %v399_v20, %v299_v0 }
  0xf7   : > { %v454_v51 = vadd.f32 %v453_v34, %v400_v26 }
  0xf9   : > { %v493_v16 = vadd.f32 %v492_v11, %v454_v51 }
 0x116   : > { %v561_v41 = vpop.f32.mrf.mxu0 }
 0x117   : > { %v562_v46 = vadd.f32 %v561_v41, %v493_v16 }
 0x11e   : > { %v598_v7 = vpop.f32.mrf.mxu1  ;;  %v639_v50 = vpop.f32.mrf.mxu2 }
 0x11f   : > { %v599_v56 = vadd.f32 %v598_v7, %v562_v46  ;;  %v740_v10 = vpop.f32.mrf.mxu3 }
 0x121   : > { %v640_v8 = vadd.f32 %v639_v50, %v599_v56 }
 0x123   : > { %v741_v62 = vadd.f32 %v740_v10, %v640_v8 }
 0x156   : > { %v794_v3 = vpop.f32.mrf.mxu0 }
 0x157   : > { %v795_v24 = vadd.f32 %v794_v3, %v741_v62 }
 0x15d   : > { %v939_v32 = vpop.f32.mrf.mxu3 }
 0x15e   : > { %v833_v15 = vpop.f32.mrf.mxu1  ;;  %v902_v30 = vpop.f32.mrf.mxu2 }
 0x15f   : > { %v834_v6 = vadd.f32 %v833_v15, %v795_v24 }
 0x161   : > { %v903_v1 = vadd.f32 %v902_v30, %v834_v6 }
 0x163   : > { %v940_v12 = vadd.f32 %v939_v32, %v903_v1 }
 0x165   : > { %942 = vst [vmem:[%s206_s30] sm:$0xff] %v940_v12 }
 0x166   : > { %1152 = shalt.err (!%p1149_p6)
}
 0x167   : > { %1069 = dma.vmem_to_hbm [thread:$0]  (%p1265_p4), %s959_s4, 128, %s961_s5, %s944_s15  }
 0x168 PF: > { %p1075_p7 = scmp.ge.s32.totalorder %s1203_s17, 2  ;;  %s972_s19 = sand.u32 1, %s1183_s12  }
 0x169   : > { %s973_s21 = scalar_lea.sflag [#allocation3], %s972_s19 }
 0x16a   : > { %p1072_p9 = pnand %p1075_p7, %p1272_p8 }
 0x16c   : > { %p1073_p10 = pneg %p1072_p9 }
 0x16e   : > { %1178 = dma.done.wait (%p1073_p10), %s973_s21, 128  }
 0x16f   : > { %1180 = vsyncadd (%p1073_p10), %s973_s21, 4294967168  ;;  %s16_s17 = sadd.s32 1, %s1203_s17   ;;  %s1905_s12 = smov %s1187_s13 }
 0x170   : > { %p13_p11 = scmp.ge.s32.totalorder %s16_s17, 4   ;;  %s1906_s13 = smov %s1191_s14 }
 0x171   : > { %s1907_s14 = smov %s1278_s25  ;;  %s1908_s15 = smov %s1199_s16 }
 0x172   : > { %s1909_s16 = smov %s1911_s20  ;;  %15 = sbr.rel (!%p13_p11) target bundleno = 4 (0x4), region = 73 }
 0x177   :  { %979 = vsyncpa [#allocation3], 1 }
 0x178   :  { %981 = vsyncpa [#allocation3 + $0x1], 1 }

</bundles_post_ra>
